<compile_context>
chip_gen: v6e
topology: v6e:2x2x1
jax: 0.10.0
libtpu: 0.0.40
codegen_flags: <defaults>
</compile_context>

<pallas_src>
import functools

import jax
import jax.numpy as jnp
from jax.experimental import pallas as pl
from jax.experimental.pallas import tpu as pltpu


N_FILTERS = 128
K_SIZES = (3, 4, 2)                   # conv1, conv2, conv3 heights (concat order)
K_MAX = max(K_SIZES)
F3 = N_FILTERS * len(K_SIZES)         # 384 pooled features
FC_OUT = 2                            # Linear(384, 2)
FC_PAD = 128                          # lane-padded FC output width


def cnn_kernel(x_ref, w_ref, b_ref, wfc_ref, bfc_ref, out_ref, *, seq_len):
    """One batch tile.

    x_ref   : (TB, seq_len + K_MAX - 1, E)  bf16  embedded input, zero-padded along L
    w_ref   : (K_MAX, E, 3*F)               bf16  stacked conv weights
    b_ref   : (1, 3*F)                      f32   stacked conv biases
    wfc_ref : (3*F, FC_PAD)                 bf16  FC weight, zero-padded columns
    bfc_ref : (1, FC_PAD)                   f32   FC bias, zero-padded
    out_ref : (TB, FC_PAD)                  f32   logits in [:, :FC_OUT]
    """
    x = x_ref[...]                                               # (TB, L+K_MAX-1, E)
    w_all = w_ref[...]                                           # (K_MAX, E, 3*F)
    tb = x.shape[0]

    # Fused conv: K_MAX shifted matmuls accumulated in f32 on the MXU.
    acc = jnp.zeros((tb, seq_len, F3), jnp.float32)
    for i in range(K_MAX):
        xi = x[:, i:i + seq_len, :]                              # (TB, L, E)
        acc = acc + jnp.einsum("ble,ef->blf", xi, w_all[i],
                               preferred_element_type=jnp.float32)

    # Per-branch max-pool over the branch's VALID time range (static slices;
    # lane ranges are exact 128-wide groups), then concat along lanes.
    pooled_parts = []
    for j, k in enumerate(K_SIZES):
        branch = acc[:, :seq_len - k + 1, j * N_FILTERS:(j + 1) * N_FILTERS]
        pooled_parts.append(jnp.max(branch, axis=1))             # (TB, F)
    pooled = jnp.concatenate(pooled_parts, axis=-1)              # (TB, 3*F)

    # Bias + ReLU on the pooled slab (equivalent to pre-pool bias+ReLU).
    pooled = jnp.maximum(pooled + b_ref[...], 0.0)

    # Dropout (eval mode) == identity.  FC head: (TB, 3*F) @ (3*F, 128) on MXU.
    logits = jnp.dot(pooled.astype(jnp.bfloat16), wfc_ref[...],
                     preferred_element_type=jnp.float32) + bfc_ref[...]
    out_ref[...] = logits.astype(out_ref.dtype)


def pack_params(params, embedding_size):
    """Pack per-branch params into the fused kernel layout (bf16 matmul dtypes)."""
    E = embedding_size
    w_stack = jnp.zeros((K_MAX, E, F3), jnp.float32)
    biases = []
    for j, k in enumerate(K_SIZES):
        # PyTorch Conv2d weight (F, 1, k, E) corresponds to w[i, e, f] = w_pt[f, 0, i, e];
        # stored here as (k*E, F) with the same (dk, de) row-major flattening.
        w = params[f"w{j + 1}"].reshape(k, E, N_FILTERS)
        w_stack = w_stack.at[:k, :, j * N_FILTERS:(j + 1) * N_FILTERS].set(w)
        biases.append(params[f"b{j + 1}"].reshape(N_FILTERS))
    b_all = jnp.concatenate(biases).reshape(1, F3).astype(jnp.float32)
    wfc_pad = jnp.zeros((F3, FC_PAD), jnp.float32).at[:, :FC_OUT].set(params["wfc"])
    bfc_pad = jnp.zeros((1, FC_PAD), jnp.float32).at[:, :FC_OUT].set(
        params["bfc"].reshape(1, FC_OUT))
    return (w_stack.astype(jnp.bfloat16), b_all,
            wfc_pad.astype(jnp.bfloat16), bfc_pad)


def cnn_forward(token_ids, emb_table, params, *, batch_tile=None):
    """token_ids: (B, L) int32; emb_table: (V, E) f32; params: dict of weights."""
    B, L = token_ids.shape
    E = emb_table.shape[1]
    if L < K_MAX:
        raise ValueError(f"sequence length {L} must be >= max kernel size {K_MAX}")

    w_stack, b_all, wfc_pad, bfc_pad = pack_params(params, E)

    # Embedding lookup (frozen table) -- glue, done in plain JAX.
    x_emb = emb_table[token_ids].astype(jnp.bfloat16)             # (B, L, E)
    # Zero-pad L so every shifted slice in the kernel has static length L.
    x_emb = jnp.pad(x_emb, ((0, 0), (0, K_MAX - 1), (0, 0)))      # (B, L+K_MAX-1, E)
    L_pad = L + K_MAX - 1

    # Batch tile: multiple of 8 so the (TB, 128) output block is tile-aligned.
    if batch_tile is None:
        batch_tile = 128 if B >= 128 else -(-B // 8) * 8
    tb = batch_tile
    n_tiles = -(-B // tb)
    b_pad = n_tiles * tb
    if b_pad != B:
        x_emb = jnp.pad(x_emb, ((0, b_pad - B), (0, 0), (0, 0)))

    kernel = functools.partial(cnn_kernel, seq_len=L)
    out = pl.pallas_call(
        kernel,
        out_shape=jax.ShapeDtypeStruct((b_pad, FC_PAD), jnp.float32),
        grid=(n_tiles,),
        in_specs=[
            pl.BlockSpec((tb, L_pad, E), lambda i: (i, 0, 0)),     # batch-tiled input
            pl.BlockSpec((K_MAX, E, F3), lambda i: (0, 0, 0)),     # weights resident
            pl.BlockSpec((1, F3), lambda i: (0, 0)),
            pl.BlockSpec((F3, FC_PAD), lambda i: (0, 0)),
            pl.BlockSpec((1, FC_PAD), lambda i: (0, 0)),
        ],
        out_specs=pl.BlockSpec((tb, FC_PAD), lambda i: (i, 0)),
        compiler_params=pltpu.CompilerParams(
            dimension_semantics=("parallel",)),
    )(x_emb, w_stack, b_all, wfc_pad, bfc_pad)
    return out[:B, :FC_OUT]


def init_params(key, embedding_size):
    """Deterministic init mirroring nn.Conv2d / nn.Linear shapes (transposed)."""
    ks = jax.random.split(key, 8)
    E = embedding_size
    params = {}
    for i, (k, wk, bk) in enumerate(zip(K_SIZES, ks[0:3], ks[3:6])):
        fan_in = k * E
        bound = 1.0 / jnp.sqrt(fan_in)
        params[f"w{i + 1}"] = jax.random.uniform(
            wk, (k * E, N_FILTERS), jnp.float32, -bound, bound)
        params[f"b{i + 1}"] = jax.random.uniform(
            bk, (1, N_FILTERS), jnp.float32, -bound, bound)
    bound = 1.0 / jnp.sqrt(F3)
    params["wfc"] = jax.random.uniform(ks[6], (F3, FC_OUT), jnp.float32, -bound, bound)
    params["bfc"] = jax.random.uniform(ks[7], (1, FC_OUT), jnp.float32, -bound, bound)
    return params


def cnn_reference(token_ids, emb_table, params):
    """Pure-JAX f32 reference matching the PyTorch module (eval mode)."""
    x = emb_table[token_ids]                                      # (B, L, E)
    feats = []
    for j, k in enumerate(K_SIZES):
        w = params[f"w{j + 1}"]                                   # (k*E, F)
        b = params[f"b{j + 1}"]                                   # (1, F)
        T = x.shape[1] - k + 1
        win = jnp.concatenate([x[:, i:i + T, :] for i in range(k)], axis=-1)
        y = jnp.einsum("bte,ef->btf", win, w) + b[None, :, :]
        feats.append(jnp.max(jax.nn.relu(y), axis=1))
    feats = jnp.concatenate(feats, axis=-1)                       # (B, 3*F)
    return feats @ params["wfc"] + params["bfc"]


if __name__ == "__main__":
    key = jax.random.PRNGKey(0)
    k_emb, k_ids, k_par = jax.random.split(key, 3)

    VOCAB, EMB, B, L = 50, 32, 2, 8

    emb_table = jax.random.normal(k_emb, (VOCAB, EMB), jnp.float32)
    token_ids = jax.random.randint(k_ids, (B, L), 0, VOCAB, jnp.int32)
    params = init_params(k_par, EMB)

    logits = cnn_forward(token_ids, emb_table, params)
    jax.block_until_ready(logits)
    assert logits.shape == (B, FC_OUT)

    ref = cnn_reference(token_ids, emb_table, params)
    assert jnp.allclose(logits, ref, atol=5e-2, rtol=5e-2), (logits, ref)
    print("KERNEL_OK")
</pallas_src>

<mosaic_0001>
module attributes {stable_mosaic.version = 11 : i64} {
  func.func @cnn_kernel(%arg0: i32, %arg1: memref<8x11x32xbf16, #tpu.memory_space<vmem>>, %arg2: memref<4x32x384xbf16, #tpu.memory_space<vmem>>, %arg3: memref<1x384xf32, #tpu.memory_space<vmem>>, %arg4: memref<384x128xbf16, #tpu.memory_space<vmem>>, %arg5: memref<1x128xf32, #tpu.memory_space<vmem>>, %arg6: memref<8x128xf32, #tpu.memory_space<vmem>>) attributes {dimension_semantics = [#tpu.dimension_semantics<parallel>], iteration_bounds = array<i64: 1>, scalar_prefetch = 0 : i64, scratch_operands = 0 : i64, tpu.core_type = #tpu.core_type<tc>, window_params = [{transform_indices = @transform_0, window_bounds = array<i64: 8, 11, 32>}, {pipeline_mode = #tpu.pipeline_mode<synchronous>, transform_indices = @transform_1, window_bounds = array<i64: 4, 32, 384>}, {pipeline_mode = #tpu.pipeline_mode<synchronous>, transform_indices = @transform_2, window_bounds = array<i64: 1, 384>}, {pipeline_mode = #tpu.pipeline_mode<synchronous>, transform_indices = @transform_3, window_bounds = array<i64: 384, 128>}, {pipeline_mode = #tpu.pipeline_mode<synchronous>, transform_indices = @transform_4, window_bounds = array<i64: 1, 128>}, {transform_indices = @transform_5, window_bounds = array<i64: 8, 128>}]} {
    %c0 = arith.constant 0 : index
    %c0_0 = arith.constant 0 : index
    %c0_1 = arith.constant 0 : index
    %0 = vector.load %arg1[%c0, %c0_0, %c0_1] : memref<8x11x32xbf16, #tpu.memory_space<vmem>>, vector<8x11x32xbf16>
    %c0_2 = arith.constant 0 : index
    %c0_3 = arith.constant 0 : index
    %c0_4 = arith.constant 0 : index
    %1 = vector.load %arg2[%c0_2, %c0_3, %c0_4] : memref<4x32x384xbf16, #tpu.memory_space<vmem>>, vector<4x32x384xbf16>
    %cst = arith.constant 0.000000e+00 : f32
    %2 = vector.broadcast %cst : f32 to vector<8x8x384xf32>
    %3 = vector.extract_strided_slice %0 {offsets = [0, 0, 0], sizes = [8, 8, 32], strides = [1, 1, 1]} : vector<8x11x32xbf16> to vector<8x8x32xbf16>
    %4 = vector.extract_strided_slice %1 {offsets = [0, 0, 0], sizes = [1, 32, 384], strides = [1, 1, 1]} : vector<4x32x384xbf16> to vector<1x32x384xbf16>
    %5 = vector.shape_cast %4 : vector<1x32x384xbf16> to vector<32x384xbf16>
    "tpu.trace_start"() <{level = 10 : i32, message = "ble,ef->blf"}> : () -> ()
    %cst_5 = arith.constant dense<0.000000e+00> : vector<8x8x384xf32>
    %6 = tpu.matmul %3, %5, %cst_5 {dimension_numbers = #tpu.dot_dimension_numbers<[2], [0], [0, 1], [1], [0, 0, 0, 1, 1, 1], [], []>} : vector<8x8x32xbf16>, vector<32x384xbf16>, vector<8x8x384xf32> -> vector<8x8x384xf32>
    "tpu.trace_stop"() : () -> ()
    %7 = arith.addf %2, %6 : vector<8x8x384xf32>
    %8 = vector.extract_strided_slice %0 {offsets = [0, 1, 0], sizes = [8, 8, 32], strides = [1, 1, 1]} : vector<8x11x32xbf16> to vector<8x8x32xbf16>
    %9 = vector.extract_strided_slice %1 {offsets = [1, 0, 0], sizes = [1, 32, 384], strides = [1, 1, 1]} : vector<4x32x384xbf16> to vector<1x32x384xbf16>
    %10 = vector.shape_cast %9 : vector<1x32x384xbf16> to vector<32x384xbf16>
    "tpu.trace_start"() <{level = 10 : i32, message = "ble,ef->blf"}> : () -> ()
    %cst_6 = arith.constant dense<0.000000e+00> : vector<8x8x384xf32>
    %11 = tpu.matmul %8, %10, %cst_6 {dimension_numbers = #tpu.dot_dimension_numbers<[2], [0], [0, 1], [1], [0, 0, 0, 1, 1, 1], [], []>} : vector<8x8x32xbf16>, vector<32x384xbf16>, vector<8x8x384xf32> -> vector<8x8x384xf32>
    "tpu.trace_stop"() : () -> ()
    %12 = arith.addf %7, %11 : vector<8x8x384xf32>
    %13 = vector.extract_strided_slice %0 {offsets = [0, 2, 0], sizes = [8, 8, 32], strides = [1, 1, 1]} : vector<8x11x32xbf16> to vector<8x8x32xbf16>
    %14 = vector.extract_strided_slice %1 {offsets = [2, 0, 0], sizes = [1, 32, 384], strides = [1, 1, 1]} : vector<4x32x384xbf16> to vector<1x32x384xbf16>
    %15 = vector.shape_cast %14 : vector<1x32x384xbf16> to vector<32x384xbf16>
    "tpu.trace_start"() <{level = 10 : i32, message = "ble,ef->blf"}> : () -> ()
    %cst_7 = arith.constant dense<0.000000e+00> : vector<8x8x384xf32>
    %16 = tpu.matmul %13, %15, %cst_7 {dimension_numbers = #tpu.dot_dimension_numbers<[2], [0], [0, 1], [1], [0, 0, 0, 1, 1, 1], [], []>} : vector<8x8x32xbf16>, vector<32x384xbf16>, vector<8x8x384xf32> -> vector<8x8x384xf32>
    "tpu.trace_stop"() : () -> ()
    %17 = arith.addf %12, %16 : vector<8x8x384xf32>
    %18 = vector.extract_strided_slice %0 {offsets = [0, 3, 0], sizes = [8, 8, 32], strides = [1, 1, 1]} : vector<8x11x32xbf16> to vector<8x8x32xbf16>
    %19 = vector.extract_strided_slice %1 {offsets = [3, 0, 0], sizes = [1, 32, 384], strides = [1, 1, 1]} : vector<4x32x384xbf16> to vector<1x32x384xbf16>
    %20 = vector.shape_cast %19 : vector<1x32x384xbf16> to vector<32x384xbf16>
    "tpu.trace_start"() <{level = 10 : i32, message = "ble,ef->blf"}> : () -> ()
    %cst_8 = arith.constant dense<0.000000e+00> : vector<8x8x384xf32>
    %21 = tpu.matmul %18, %20, %cst_8 {dimension_numbers = #tpu.dot_dimension_numbers<[2], [0], [0, 1], [1], [0, 0, 0, 1, 1, 1], [], []>} : vector<8x8x32xbf16>, vector<32x384xbf16>, vector<8x8x384xf32> -> vector<8x8x384xf32>
    "tpu.trace_stop"() : () -> ()
    %22 = arith.addf %17, %21 : vector<8x8x384xf32>
    %23 = vector.extract_strided_slice %22 {offsets = [0, 0, 0], sizes = [8, 6, 128], strides = [1, 1, 1]} : vector<8x8x384xf32> to vector<8x6x128xf32>
    %cst_9 = arith.constant dense<0xFF800000> : vector<8x128xf32>
    %24 = vector.multi_reduction <maximumf>, %23, %cst_9 [1] : vector<8x6x128xf32> to vector<8x128xf32>
    %25 = vector.extract_strided_slice %22 {offsets = [0, 0, 128], sizes = [8, 5, 128], strides = [1, 1, 1]} : vector<8x8x384xf32> to vector<8x5x128xf32>
    %cst_10 = arith.constant dense<0xFF800000> : vector<8x128xf32>
    %26 = vector.multi_reduction <maximumf>, %25, %cst_10 [1] : vector<8x5x128xf32> to vector<8x128xf32>
    %27 = vector.extract_strided_slice %22 {offsets = [0, 0, 256], sizes = [8, 7, 128], strides = [1, 1, 1]} : vector<8x8x384xf32> to vector<8x7x128xf32>
    %cst_11 = arith.constant dense<0xFF800000> : vector<8x128xf32>
    %28 = vector.multi_reduction <maximumf>, %27, %cst_11 [1] : vector<8x7x128xf32> to vector<8x128xf32>
    %29 = tpu.concatenate %24, %26, %28 in 1 : vector<8x128xf32>, vector<8x128xf32>, vector<8x128xf32> -> vector<8x384xf32>
    %c0_12 = arith.constant 0 : index
    %c0_13 = arith.constant 0 : index
    %30 = vector.load %arg3[%c0_12, %c0_13] : memref<1x384xf32, #tpu.memory_space<vmem>>, vector<1x384xf32>
    %31 = vector.broadcast %30 : vector<1x384xf32> to vector<8x384xf32>
    %32 = arith.addf %29, %31 : vector<8x384xf32>
    %cst_14 = arith.constant 0.000000e+00 : f32
    %33 = vector.broadcast %cst_14 : f32 to vector<8x384xf32>
    %34 = arith.maximumf %32, %33 : vector<8x384xf32>
    %35 = arith.truncf %34 : vector<8x384xf32> to vector<8x384xbf16>
    %c0_15 = arith.constant 0 : index
    %c0_16 = arith.constant 0 : index
    %36 = vector.load %arg4[%c0_15, %c0_16] : memref<384x128xbf16, #tpu.memory_space<vmem>>, vector<384x128xbf16>
    %cst_17 = arith.constant dense<0.000000e+00> : vector<8x128xf32>
    %37 = tpu.matmul %35, %36, %cst_17 {dimension_numbers = #tpu.dot_dimension_numbers<[1], [0], [0], [1], [0, 0, 1, 1], [], []>} : vector<8x384xbf16>, vector<384x128xbf16>, vector<8x128xf32> -> vector<8x128xf32>
    %c0_18 = arith.constant 0 : index
    %c0_19 = arith.constant 0 : index
    %38 = vector.load %arg5[%c0_18, %c0_19] : memref<1x128xf32, #tpu.memory_space<vmem>>, vector<1x128xf32>
    %39 = vector.broadcast %38 : vector<1x128xf32> to vector<8x128xf32>
    %40 = arith.addf %37, %39 : vector<8x128xf32>
    %c0_20 = arith.constant 0 : index
    %c0_21 = arith.constant 0 : index
    %41 = vector.load %arg6[%c0_20, %c0_21] : memref<8x128xf32, #tpu.memory_space<vmem>>, vector<8x128xf32>
    tpu.vector_store %arg6[%c0_20, %c0_21], %40 {strides = array<i32>} : memref<8x128xf32, #tpu.memory_space<vmem>>, vector<8x128xf32>,
    return
  }
  func.func @transform_0(%arg0: i32) -> (i32, i32, i32) {
    %c0_i32 = arith.constant 0 : i32
    %c0_i32_0 = arith.constant 0 : i32
    %c0_i32_1 = arith.constant 0 : i32
    return %arg0, %c0_i32, %c0_i32_0 : i32, i32, i32
  }
  func.func @transform_1(%arg0: i32) -> (i32, i32, i32) {
    %c0_i32 = arith.constant 0 : i32
    %c0_i32_0 = arith.constant 0 : i32
    %c0_i32_1 = arith.constant 0 : i32
    %c0_i32_2 = arith.constant 0 : i32
    return %c0_i32, %c0_i32_0, %c0_i32_1 : i32, i32, i32
  }
  func.func @transform_2(%arg0: i32) -> (i32, i32) {
    %c0_i32 = arith.constant 0 : i32
    %c0_i32_0 = arith.constant 0 : i32
    %c0_i32_1 = arith.constant 0 : i32
    return %c0_i32, %c0_i32_0 : i32, i32
  }
  func.func @transform_3(%arg0: i32) -> (i32, i32) {
    %c0_i32 = arith.constant 0 : i32
    %c0_i32_0 = arith.constant 0 : i32
    %c0_i32_1 = arith.constant 0 : i32
    return %c0_i32, %c0_i32_0 : i32, i32
  }
  func.func @transform_4(%arg0: i32) -> (i32, i32) {
    %c0_i32 = arith.constant 0 : i32
    %c0_i32_0 = arith.constant 0 : i32
    %c0_i32_1 = arith.constant 0 : i32
    return %c0_i32, %c0_i32_0 : i32, i32
  }
  func.func @transform_5(%arg0: i32) -> (i32, i32) {
    %c0_i32 = arith.constant 0 : i32
    %c0_i32_0 = arith.constant 0 : i32
    return %arg0, %c0_i32 : i32, i32
  }
}

</mosaic_0001>

<bundles_post_ra>
// kernel: tpu_custom_call.1
= control target key start
LH: loop header
LB: loop body
LE: loop exit
PB: predicated region body
PF: predicated region fallthrough
CT: control target
= control target key end

     0   :  { %10 = vsyncpa [#allocation3], 0  ;;  %s2668_s0 = inlined_call_operand.vmem [shape: bf16[8,11,32], index: 0, kind: input, shape index: {}]   ;;  %s2669_s1 = inlined_call_operand.hbm [shape: bf16[4,32,384], index: 1, kind: input, shape index: {}]   ;;  %s2670_s2 = inlined_call_operand.vmem [shape: f32[1,384], index: 2, kind: input, shape index: {}]   ;;  %s2671_s3 = inlined_call_operand.hbm [shape: bf16[384,128], index: 3, kind: input, shape index: {}]   ;;  %s2672_s4 = inlined_call_operand.vmem [shape: f32[1,128], index: 4, kind: input, shape index: {}]   ;;  %s2673_s5 = inlined_call_operand.hbm [shape: f32[8,128], index: 5, kind: output, shape index: {}]  }
   0x1   :  { %11 = vsyncpa [#allocation6], 0 }
   0x2   :  { %12 = vsyncpa [#allocation4], 0  ;;  %s2088_s18 = smov [#allocation2]  }
   0x3   :  { %s20_s19 = sshll.u32 %s2088_s18, 4  ;;  %s21_s19 = int_to_ptr.vmem [resolvable:$true] %s20_s19 }
   0x4   :  { %s2030_s20 = scalar_lea.vmem %s21_s19, 3072  ;;  %p2035_p1 = scmp.lt.s32.totalorder %s21_s19, %s21_s19 }
   0x5   :  { %p2031_p0 = scmp.ne.s32.totalorder %s21_s19, %s2030_s20  ;;  %p2036_p2 = scmp.lt.s32.totalorder %s2030_s20, %s2030_s20 }
   0x7   :  { %p2037_p3 = por %p2036_p2, %p2035_p1 }
   0x9   :  { %p2038_p4 = pnand %p2037_p3, %p2031_p0 }
   0xb   :  { %2041 = shalt.err (!%p2038_p4)
}
   0xc   :  { %s2089_s21 = smov 192   ;;  %s2090_s22 = smov 12  }
   0xd   :  { %26 = dma.hbm_to_vmem [thread:$0]  %s2669_s1, 3072, %s21_s19, [#allocation3], %s2089_s21, %s2089_s21, %s2090_s22  }
   0xe   :  { %s2091_s25 = smov [#allocation5]  }
   0xf   :  { %s34_s26 = sshll.u32 %s2091_s25, 4  ;;  %s35_s26 = int_to_ptr.vmem [resolvable:$true] %s34_s26 }
  0x10   :  { %s2050_s27 = scalar_lea.vmem %s35_s26, 3072  ;;  %p2055_p6 = scmp.lt.s32.totalorder %s35_s26, %s35_s26 }
  0x11   :  { %p2051_p5 = scmp.ne.s32.totalorder %s35_s26, %s2050_s27  ;;  %p2056_p7 = scmp.lt.s32.totalorder %s2050_s27, %s2050_s27 }
  0x13   :  { %p2057_p8 = por %p2056_p7, %p2055_p6 }
  0x15   :  { %p2058_p9 = pnand %p2057_p8, %p2051_p5 }
  0x17   :  { %2061 = shalt.err (!%p2058_p9)
}
  0x18   :  { %s2092_s28 = smov 64   ;;  %s2093_s29 = smov 4  }
  0x19   :  { %40 = dma.hbm_to_vmem [thread:$0]  %s2671_s3, 3072, %s35_s26, [#allocation6], %s2092_s28, %s2092_s28, %s2093_s29  }
  0x1a   :  { %2082 = dma.done.wait [#allocation3], 3072  }
  0x1b   :  { %2083 = vsyncadd [#allocation3], 4294964224 }
  0x1c   :  { %2084 = dma.done.wait [#allocation6], 3072  }
  0x1d   :  { %2085 = vsyncadd [#allocation6], 4294964224  ;;  %v2094_v0 = vmov 0   ;;  %v1962_v1 = vld [vmem:[#allocation2 + $0x4c] ss:$12 sps:$4 sm:$0xff]   ;;  %vm257_vm3 = vcmask 261120  }
  0x1e   :  { %302 = vmatprep.mubr.bf16.mxu0 %v2094_v0  ;;  %332 = vmatprep.mubr.bf16.mxu1 %v2094_v0  ;;  %v1964_v2 = vld [vmem:[#allocation2 + $0x48] ss:$12 sps:$4 sm:$0xff]   ;;  %vm98_vm0 = vsmask.f32 3328  ;;  %v1967_v4 = vld [vmem:[#allocation2 + $0x30] ss:$12 sps:$4 sm:$0xff]  }
  0x1f   :  { %1948 = vmatprep.subr.bf16.mxu1 %v1962_v1  ;;  %282 = vmatprep.subr.bf16.mxu0 %v1962_v1  ;;  %v1965_v3 = vld [vmem:[#allocation2 + $0x34] ss:$12 sps:$4 sm:$0xff]   ;;  %v2136_v5 = vld [vmem:[#allocation2 + $0x50] ss:$12 sps:$4 sm:$0xff]   ;;  %v2146_v7 = vld [vmem:[%s2668_s0 + $0x4] sm:$0x3] }
  0x20   :  { %1950 = vmatpush1.bf16.msra.mxu1 %v1964_v2  ;;  %283 = vmatpush1.bf16.msra.mxu0 %v1964_v2  ;;  %v2141_v6 = vld [vmem:[%s2668_s0] sm:$0xf]  ;;  %v2151_v8 = vld [vmem:[%s2668_s0 + $0x8] sm:$0xf]  ;;  %v2156_v9 = vld [vmem:[%s2668_s0 + $0xc] sm:$0x3] }
  0x21   :  { %1949 = vmatprep.subr.bf16.mxu1 %v1965_v3  ;;  %284 = vmatprep.subr.bf16.mxu0 %v1965_v3  ;;  %v102_v10 = vshrl.u32 %v2141_v6, 16  ;;  %v105_v11 = vshll.u32 %v2141_v6, 16  ;;  %v111_v12 = vshll.u32 %v2146_v7, 16  ;;  %v116_v13 = vshrl.u32 %v2151_v8, 16  ;;  %v2165_v14 = vld [vmem:[%s2668_s0 + $0x30] sm:$0xf] }
  0x22   :  { %vm99_vm1 = vsmask.f32 7440  ;;  %v119_v15 = vshll.u32 %v2151_v8, 16  ;;  %v125_v16 = vshll.u32 %v2156_v9, 16  ;;  %v2172_v17 = vld [vmem:[%s2668_s0 + $0x34] sm:$0x3] }
  0x23   :  { %v104_v18 = vrot.slane %v102_v10, 4  ;;  %v107_v19 = vrot.slane %v105_v11, 5  ;;  %v113_v20 = vrot.slane %v111_v12, 5  ;;  %v118_v21 = vrot.slane %v116_v13, 4  ;;  %v2185_v22 = vld [vmem:[%s2668_s0 + $0x38] sm:$0xf]  ;;  %vm2204_vm2 = vmor %vm98_vm0, %vm99_vm1 }
  0x24   :  { %1951 = vmatpush1.bf16.msra.mxu1 %v1967_v4  ;;  %285 = vmatpush1.bf16.msra.mxu0 %v1967_v4  ;;  %v121_v23 = vrot.slane %v119_v15, 5  ;;  %v127_v24 = vrot.slane %v125_v16, 5  ;;  %v2195_v25 = vld [vmem:[%s2668_s0 + $0x3c] sm:$0x3]  ;;  %v186_v26 = vshrl.u32 %v2165_v14, 16  ;;  %v189_v27 = vshll.u32 %v2165_v14, 16 }
  0x25   :  { %1880 = vmatprep.subr.bf16.mxu1 %v2136_v5  ;;  %v108_v28 = vor.u32 %v107_v19, %v104_v18  ;;  %v195_v29 = vshll.u32 %v2172_v17, 16  ;;  %v200_v30 = vshrl.u32 %v2185_v22, 16  ;;  %v203_v31 = vshll.u32 %v2185_v22, 16  ;;  %v2226_v46 = vld [vmem:[%s2668_s0 + $0x10] sm:$0xf]  ;;  %s2097_s12 = smov [#allocation7]  }
  0x26   :  { %v122_v33 = vor.u32 %v121_v23, %v118_v21  ;;  %v188_v34 = vrot.slane %v186_v26, 4  ;;  %v191_v35 = vrot.slane %v189_v27, 5  ;;  %v209_v36 = vshll.u32 %v2195_v25, 16  ;;  %v2231_v47 = vld [vmem:[%s2668_s0 + $0x14] sm:$0x3]  ;;  %s1710_s13 = sshll.u32 %s2097_s12, 4  ;;  %s1711_s13 = int_to_ptr.vmem [resolvable:$true] %s1710_s13 }
  0x27   :  { %v109_v37 = vrot.slane %v108_v28, 4  ;;  %v202_v38 = vrot.slane %v200_v30, 4  ;;  %v205_v39 = vrot.slane %v203_v31, 5  ;;  %v197_v42 = vrot.slane %v195_v29, 5  ;;  %v2236_v48 = vld [vmem:[%s2668_s0 + $0x18] sm:$0xf]  ;;  %p2067_p11 = scmp.lt.s32.totalorder %s1711_s13, %s1711_s13 }
  0x28   :  { %v123_v40 = vrot.slane %v122_v33, 4  ;;  %v192_v41 = vor.u32 %v191_v35, %v188_v34  ;;  %v211_v43 = vrot.slane %v209_v36, 5  ;;  %v2243_v51 = vld [vmem:[%s2668_s0 + $0x1c] sm:$0x3]  ;;  %v130_v52 = vshrl.u32 %v2226_v46, 16  ;;  %s2062_s14 = scalar_lea.vmem %s1711_s13, 128 }
  0x29   :  { %v114_v44 = vsel %vm2204_vm2, %v109_v37, %v113_v20  ;;  %v206_v45 = vor.u32 %v205_v39, %v202_v38  ;;  %v133_v53 = vshll.u32 %v2226_v46, 16  ;;  %vm871_vm4 = vsmask.f32 2304  ;;  %v1969_v4 = vld [vmem:[#allocation2 + $0x38] ss:$12 sps:$4 sm:$0xff]   ;;  %p2063_p10 = scmp.ne.s32.totalorder %s1711_s13, %s2062_s14  ;;  %p2068_p12 = scmp.lt.s32.totalorder %s2062_s14, %s2062_s14 }
  0x2a   :  { %v128_v49 = vsel %vm2204_vm2, %v123_v40, %v127_v24  ;;  %v193_v50 = vrot.slane %v192_v41, 4  ;;  %vm872_vm5 = vsmask.f32 6416  ;;  %v139_v56 = vshll.u32 %v2231_v47, 16  ;;  %v2262_v21 = vld [vmem:[%s2668_s0 + $0x20] sm:$0xf] }
  0x2b   :  { %v1720_v54 = vcombine.low %v114_v44, %v128_v49  ;;  %v207_v55 = vrot.slane %v206_v45, 4  ;;  %v144_v57 = vshrl.u32 %v2236_v48, 16  ;;  %v132_v59 = vrot.slane %v130_v52, 4  ;;  %v2268_v34 = vld [vmem:[%s2668_s0 + $0x24] sm:$0x3]  ;;  %vm2299_vm6 = vmor %vm871_vm4, %vm872_vm5  ;;  %p2069_p13 = por %p2068_p12, %p2067_p11 }
  0x2c   :  { %v198_v58 = vsel %vm2204_vm2, %v193_v50, %v197_v42  ;;  %v135_v60 = vrot.slane %v133_v53, 5  ;;  %v147_v61 = vshll.u32 %v2236_v48, 16  ;;  %v141_v63 = vrot.slane %v139_v56, 5  ;;  %v1972_v35 = vld [vmem:[#allocation2 + $0x1c] ss:$12 sps:$4 sm:$0xff]  }
  0x2d   :  { %1730 = vmatmul.mubr.msk.bf16.vlgmr.msra.gmra.mxu0 %vm257_vm3, %v1720_v54  ;;  %v212_v62 = vsel %vm2204_vm2, %v207_v55, %v211_v43  ;;  %v146_v1 = vrot.slane %v144_v57, 4  ;;  %v153_v2 = vshll.u32 %v2243_v51, 16  ;;  %v894_v20 = vrot.slane %v130_v52, 5  ;;  %v2275_v41 = vld [vmem:[%s2668_s0 + $0x28] sm:$0xf]  ;;  %p2070_p0 = pnand %p2069_p13, %p2063_p10 }
  0x2e   :  { %v2256_v3 = vcombine.low %v198_v58, %v212_v62  ;;  %312 = vmatprep.mubr.bf16.mxu0 %v2094_v0  ;;  %v136_v18 = vor.u32 %v135_v60, %v132_v59  ;;  %v149_v19 = vrot.slane %v147_v61, 5  ;;  %v895_v24 = vrot.slane %v133_v53, 6  ;;  %v2283_v49 = vld [vmem:[%s2668_s0 + $0x2c] sm:$0x3] }
  0x2f   :  { %v155_v23 = vrot.slane %v153_v2, 5  ;;  %v898_v28 = vshrl.u32 %v2231_v47, 16  ;;  %v901_v33 = vrot.slane %v139_v56, 6  ;;  %v904_v39 = vrot.slane %v144_v57, 5  ;;  %v1976_v55 = vld [vmem:[#allocation2 + $0x20] ss:$12 sps:$4 sm:$0xff]  }
  0x30   :  { %1733 = vmatmul.mubr.msk.bf16.vlgmr.msra.gmra.mxu1 %vm257_vm3, %v2256_v3  ;;  %v137_v37 = vrot.slane %v136_v18, 4  ;;  %v150_v38 = vor.u32 %v149_v19, %v146_v1  ;;  %v905_v40 = vrot.slane %v147_v61, 6  ;;  %v896_v42 = vor.u32 %v895_v24, %v894_v20  ;;  %1892 = vmatprep.subr.bf16.mxu0 %v1976_v55  ;;  %v1977_v1 = vld [vmem:[#allocation2 + $0x8] ss:$12 sps:$4 sm:$0xff]  }
  0x31   :  { %1881 = vmatpush3.bf16.msra.mxu1 %v2136_v5  ;;  %1884 = vmatprep.mubr.msk.bf16.mxu1 %vm257_vm3, %v1720_v54  ;;  %v900_v43 = vrot.slane %v898_v28, 5  ;;  %v908_v44 = vshrl.u32 %v2243_v51, 16  ;;  %v911_v45 = vrot.slane %v153_v2, 6  ;;  %v158_v5 = vshrl.u32 %v2262_v21, 16  ;;  %v1970_v54 = vld [vmem:[#allocation2 + $0x18] ss:$12 sps:$4 sm:$0xff]  }
  0x32   :  { %1882 = vmatprep.subr.bf16.mxu1 %v1969_v4  ;;  %v142_v50 = vsel %vm2204_vm2, %v137_v37, %v141_v63  ;;  %v151_v52 = vrot.slane %v150_v38, 4  ;;  %v906_v53 = vor.u32 %v905_v40, %v904_v39  ;;  %v897_v56 = vrot.slane %v896_v42, 4  ;;  %1893 = vmatpush3.bf16.msra.mxu0 %v1976_v55  ;;  %v1985_v38 = vld [vmem:[#allocation2 + $0x7c] ss:$12 sps:$4 sm:$0xff]   ;;  %v1973_v40 = vld [vmem:[#allocation2] ss:$12 sps:$4 sm:$0xff]  }
  0x33   :  { %v902_v57 = vor.u32 %v901_v33, %v900_v43  ;;  %v910_v58 = vrot.slane %v908_v44, 5  ;;  %v161_v59 = vshll.u32 %v2262_v21, 16  ;;  %v160_v62 = vrot.slane %v158_v5, 4  ;;  %1894 = vmatprep.subr.bf16.mxu0 %v1977_v1 }
  0x34   :  { %v156_v60 = vsel %vm2204_vm2, %v151_v52, %v155_v23  ;;  %v907_v61 = vrot.slane %v906_v53, 4  ;;  %v167_v63 = vshll.u32 %v2268_v34, 16  ;;  %v172_v20 = vshrl.u32 %v2275_v41, 16  ;;  %v1979_v53 = vld [vmem:[#allocation2 + $0x80] ss:$12 sps:$4 sm:$0xff]  }
  0x35   :  { %1883 = vmatpush3.bf16.msra.mxu1 %v1969_v4  ;;  %v1721_v2 = vcombine.low %v142_v50, %v156_v60  ;;  %v912_v18 = vor.u32 %v911_v45, %v910_v58  ;;  %v163_v19 = vrot.slane %v161_v59, 5  ;;  %v175_v24 = vshll.u32 %v2275_v41, 16  ;;  %v1975_v4 = vld [vmem:[#allocation2 + $0x4] ss:$12 sps:$4 sm:$0xff]  }
  0x36   :  { %484 = vmatprep.subr.bf16.mxu1 %v1972_v35  ;;  %v181_v28 = vshll.u32 %v2283_v49, 16  ;;  %v174_v37 = vrot.slane %v172_v20, 4  ;;  %v169_v35 = vrot.slane %v167_v63, 5  ;;  %v903_v42 = vsel %vm2299_vm6, %v897_v56, %v902_v57  ;;  %1895 = vmatpush3.bf16.msra.mxu0 %v1977_v1 }
  0x37   :  { %1731 = vmatmul.mubr.msk.bf16.gmra.mxu0 %vm257_vm3, %v1721_v2  ;;  %v164_v33 = vor.u32 %v163_v19, %v160_v62  ;;  %v177_v39 = vrot.slane %v175_v24, 5  ;;  %v913_v43 = vsel %vm2299_vm6, %v907_v61, %v912_v18  ;;  %721 = vmatprep.subr.bf16.mxu0 %v1985_v38  ;;  %vm618_vm7 = vcmask 1042432  }
  0x38   :  { %1885 = vmatmul.mubr.msk.bf16.vlgmr.msra.gmra.mxu1 %vm257_vm3, %v1721_v2  ;;  %322 = vmatprep.mubr.bf16.mxu0 %v2094_v0  ;;  %v2318_v45 = vcombine.low %v903_v42, %v913_v43  ;;  %v183_v52 = vrot.slane %v181_v28, 5  ;;  %vm619_vm8 = vcmask 1046532   ;;  %v1738_v56 = vcombine.low %v2141_v6, %v2151_v8 }
  0x39   :  { %485 = vmatpush1.bf16.msra.mxu1 %v1970_v54  ;;  %v165_v44 = vrot.slane %v164_v33, 4  ;;  %v178_v50 = vor.u32 %v177_v39, %v174_v37  ;;  %v1762_v57 = vrot.slane %v2165_v14, 9  ;;  %v647_v61 = vrot.slane %v2172_v17, 5  ;;  %vm2331_vm9 = vmor %vm618_vm7, %vm619_vm8 }
  0x3a   :  { %486 = vmatprep.subr.bf16.mxu1 %v1975_v4  ;;  %v1763_v62 = vrot.slane %v2185_v22, 9  ;;  %v651_v2 = vrot.slane %v2195_v25, 5  ;;  %v874_v32 = vrot.slane %v102_v10, 5  ;;  %v875_v18 = vrot.slane %v105_v11, 6 }
  0x3b   :  { %v170_v55 = vsel %vm2204_vm2, %v165_v44, %v169_v35  ;;  %v179_v58 = vrot.slane %v178_v50, 4  ;;  %v648_v19 = vsel %vm2331_vm9, %v1762_v57, %v647_v61  ;;  %v878_v4 = vshrl.u32 %v2146_v7, 16  ;;  %v1983_v50 = vld [vmem:[#allocation2 + $0x78] ss:$12 sps:$4 sm:$0xff]  }
  0x3c   :  { %v881_v33 = vrot.slane %v111_v12, 6  ;;  %v884_v37 = vrot.slane %v116_v13, 5  ;;  %v652_v10 = vsel %vm2331_vm9, %v1763_v62, %v651_v2  ;;  %v876_v11 = vor.u32 %v875_v18, %v874_v32 }
  0x3d   :  { %487 = vmatpush1.bf16.msra.mxu1 %v1973_v40  ;;  %v184_v54 = vsel %vm2204_vm2, %v179_v58, %v183_v52  ;;  %v885_v38 = vrot.slane %v119_v15, 6  ;;  %v888_v35 = vshrl.u32 %v2156_v9, 16  ;;  %v2358_v12 = vcombine.low %v648_v19, %v652_v10  ;;  %v1988_v58 = vld [vmem:[#allocation2 + $0x64] ss:$12 sps:$4 sm:$0xff]   ;;  %v1992_v19 = vld [vmem:[#allocation2 + $0xac] ss:$12 sps:$4 sm:$0xff]  }
  0x3e   :  { %1904 = vmatprep.subr.bf16.mxu1 %v1979_v53  ;;  %v1722_v60 = vcombine.low %v170_v55, %v184_v54  ;;  %v880_v39 = vrot.slane %v878_v4, 5  ;;  %v891_v13 = vrot.slane %v125_v16, 6  ;;  %v1739_v43 = vcombine.low %v2226_v46, %v2236_v48  ;;  %v1989_v54 = vld [vmem:[#allocation2 + $0x68] ss:$12 sps:$4 sm:$0xff]  }
  0x3f   :  { %v886_v40 = vor.u32 %v885_v38, %v884_v37  ;;  %v890_v42 = vrot.slane %v888_v35, 5  ;;  %v1740_v15 = vcombine.low %v2262_v21, %v2275_v41  ;;  %v623_v16 = vrot.slane %v2146_v7, 5  ;;  %v1986_v7 = vld [vmem:[#allocation2 + $0x60] ss:$12 sps:$4 sm:$0xff]  }
  0x40   :  { %1888 = vmatprep.mubr.msk.bf16.mxu1 %vm257_vm3, %v1722_v60  ;;  %1732 = vmatmul.mubr.msk.bf16.gmra.mxu0 %vm257_vm3, %v1722_v60  ;;  %v882_v44 = vor.u32 %v881_v33, %v880_v39  ;;  %v934_v61 = vrot.slane %v186_v26, 5  ;;  %v627_v62 = vrot.slane %v2156_v9, 5  ;;  %v935_v32 = vrot.slane %v189_v27, 6 }
  0x41   :  { %1889 = vmatmul.mubr.msk.bf16.gmra.mxu1 %vm257_vm3, %v2256_v3  ;;  %1896 = vmatprep.mubr.msk.bf16.mxu0 %vm257_vm3, %v1738_v56  ;;  %v877_v3 = vrot.slane %v876_v11, 4  ;;  %v887_v52 = vrot.slane %v886_v40, 4  ;;  %v892_v55 = vor.u32 %v891_v13, %v890_v42  ;;  %v1756_v18 = vrot.slane %v2141_v6, 9  ;;  %v1997_v13 = vld [vmem:[#allocation2 + $0x98] ss:$12 sps:$4 sm:$0xff]  }
  0x42   :  { %504 = vmatprep.mubr.bf16.mxu1 %v2094_v0  ;;  %v938_v4 = vshrl.u32 %v2172_v17, 16  ;;  %v941_v9 = vrot.slane %v195_v29, 6  ;;  %v944_v26 = vrot.slane %v200_v30, 5  ;;  %v1757_v27 = vrot.slane %v2151_v8, 9 }
  0x43   :  { %v883_v57 = vsel %vm2299_vm6, %v877_v3, %v882_v44  ;;  %v893_v60 = vsel %vm2299_vm6, %v887_v52, %v892_v55  ;;  %v936_v33 = vor.u32 %v935_v32, %v934_v61  ;;  %v945_v37 = vrot.slane %v203_v31, 6  ;;  %v1996_v32 = vld [vmem:[#allocation2 + $0x94] ss:$12 sps:$4 sm:$0xff]  }
  0x44   :  { %v2375_v2 = vcombine.low %v883_v57, %v893_v60  ;;  %v1758_v6 = vrot.slane %v2226_v46, 9  ;;  %v940_v10 = vrot.slane %v938_v4, 5  ;;  %v948_v17 = vshrl.u32 %v2195_v25, 16 }
  0x45   :  { %v951_v29 = vrot.slane %v209_v36, 6  ;;  %v1741_v30 = vcombine.low %v2165_v14, %v2185_v22  ;;  %v631_v8 = vrot.slane %v2231_v47, 5  ;;  %v946_v11 = vor.u32 %v945_v37, %v944_v26  ;;  %v2002_v26 = vld [vmem:[#allocation5 + $0x78] sm:$0xff]   ;;  %v2007_v37 = vld [vmem:[#allocation5 + $0x90] sm:$0xff]  }
  0x46   :  { %v1759_v31 = vrot.slane %v2236_v48, 9  ;;  %v942_v38 = vor.u32 %v941_v9, %v940_v10  ;;  %v950_v35 = vrot.slane %v948_v17, 5  ;;  %v635_v46 = vrot.slane %v2243_v51, 5  ;;  %v2009_v10 = vld [vmem:[#allocation5 + $0x28] sm:$0xff]  }
  0x47   :  { %v947_v39 = vrot.slane %v946_v11, 4  ;;  %v624_v14 = vsel %vm2331_vm9, %v1756_v18, %v623_v16  ;;  %v628_v22 = vsel %vm2331_vm9, %v1757_v27, %v627_v62  ;;  %v632_v3 = vsel %vm2331_vm9, %v1758_v6, %v631_v8  ;;  %v1990_v16 = vld [vmem:[#allocation2 + $0xa8] ss:$12 sps:$4 sm:$0xff]   ;;  %v2003_v27 = vld [vmem:[#allocation5 + $0x38] sm:$0xff]   ;;  %v2012_v8 = vld [vmem:[#allocation5 + $0x20] sm:$0xff]  }
  0x48   :  { %1897 = vmatmul.mubr.msk.bf16.vlgmr.msra.gmra.mxu0 %vm257_vm3, %v1739_v43  ;;  %v952_v36 = vor.u32 %v951_v29, %v950_v35  ;;  %v1764_v51 = vcombine.low %v624_v14, %v628_v22  ;;  %v636_v40 = vsel %vm2331_vm9, %v1759_v31, %v635_v46  ;;  %v639_v44 = vrot.slane %v2268_v34, 5  ;;  %v2008_v6 = vld [vmem:[#allocation5 + $0x68] sm:$0xff]   ;;  %v2011_v29 = vld [vmem:[#allocation5 + $0x60] sm:$0xff]   ;;  %v2015_v46 = vld [vmem:[#allocation5 + $0x18] sm:$0xff]  }
  0x49   :  { %1748 = vmatmul.mubr.msk.bf16.vlgmr.msra.gmra.mxu1 %vm257_vm3, %v1738_v56  ;;  %1900 = vmatprep.mubr.msk.bf16.mxu0 %vm257_vm3, %v1740_v15  ;;  %v1993_v56 = vld [vmem:[#allocation2 + $0xb0] ss:$12 sps:$4 sm:$0xff]   ;;  %v1765_v42 = vcombine.low %v632_v3, %v636_v40  ;;  %v915_v57 = vrot.slane %v161_v59, 6  ;;  %v918_v60 = vshrl.u32 %v2268_v34, 16  ;;  %v924_v61 = vrot.slane %v172_v20, 5  ;;  %v2010_v17 = vld [vmem:[#allocation5 + $0x88] sm:$0xff]  }
  0x4a   :  { %1905 = vmatpush3.bf16.msra.mxu1 %v1979_v53  ;;  %514 = vmatprep.mubr.bf16.mxu1 %v2094_v0  ;;  %v937_v53 = vrot.slane %v936_v33, 4  ;;  %v953_v47 = vsel %vm2299_vm6, %v947_v39, %v952_v36  ;;  %v925_v62 = vrot.slane %v175_v24, 6  ;;  %v928_v1 = vshrl.u32 %v2283_v49, 16  ;;  %v1994_v59 = vld [vmem:[#allocation2 + $0x90] ss:$12 sps:$4 sm:$0xff]   ;;  %v2019_v3 = vld [vmem:[#allocation5 + $0x8] sm:$0xff]  }
  0x4b   :  { %722 = vmatpush1.bf16.msra.mxu0 %v1983_v50  ;;  %1906 = vmatprep.subr.bf16.mxu1 %v1989_v54  ;;  %v1761_v50 = vrot.slane %v2275_v41, 9  ;;  %v920_v20 = vrot.slane %v918_v60, 5  ;;  %v2095_v23 = vmov 0.0   ;;  %v2006_v33 = vld [vmem:[#allocation5 + $0x30] sm:$0xff]   ;;  %vm2096_vm10 = vmmov 0   ;;  %v2020_v40 = vld [vmem:[#allocation5 + $0x40] sm:$0xff]  }
  0x4c   :  { %723 = vmatprep.subr.bf16.mxu0 %v1988_v58  ;;  %v943_v25 = vsel %vm2299_vm6, %v937_v53, %v942_v38  ;;  %v926_v41 = vor.u32 %v925_v62, %v924_v61  ;;  %v930_v24 = vrot.slane %v928_v1, 5  ;;  %v2013_v53 = vld [vmem:[#allocation5 + $0x80] sm:$0xff]   ;;  %v2014_v38 = vld [vmem:[#allocation5 + $0x58] sm:$0xff]   ;;  %v2016_v14 = vld [vmem:[#allocation5 + $0x50] sm:$0xff]   ;;  %vm1286_vm11 = vcmask 1046528  }
  0x4d   :  { %v2412_v48 = vcombine.low %v943_v25, %v953_v47  ;;  %v2017_v22 = vld [vmem:[#allocation5 + $0x10] sm:$0xff]   ;;  %vm1172_vm12 = vcmask 1045504   ;;  %vm1229_vm13 = vcmask 1044480   ;;  %vm1351_vm14 = vcmask 1041409  }
  0x4e   :  { %1907 = vmatpush3.bf16.msra.mxu1 %v1989_v54  ;;  %v914_v54 = vrot.slane %v158_v5, 5  ;;  %v921_v5 = vrot.slane %v167_v63, 6  ;;  %v927_v4 = vrot.slane %v926_v41, 4  ;;  %vm1353_vm15 = vcmask 1042434  }
  0x4f   :  { %724 = vmatpush1.bf16.msra.mxu0 %v1986_v7  ;;  %1022 = vmatprep.subr.bf16.mxu1 %v1992_v19  ;;  %v931_v7 = vrot.slane %v181_v28, 6  ;;  %v1998_v28 = vld [vmem:[#allocation5 + $0xb8] sm:$0xff]   ;;  %vm1355_vm0 = vcmask 1043459   ;;  %vm1357_vm1 = vcmask 1044484   ;;  %vm1359_vm2 = vcmask 1045509  }
  0x50   :  { %1901 = vmatmul.mubr.msk.bf16.gmra.mxu0 %vm257_vm3, %v1741_v30  ;;  %1916 = vmatprep.subr.bf16.mxu0 %v1993_v56  ;;  %v922_v19 = vor.u32 %v921_v5, %v920_v20  ;;  %vm1363_vm4 = vcmask 1047559  }
  0x51   :  { %1749 = vmatmul.mubr.msk.bf16.gmra.mxu1 %vm257_vm3, %v1739_v43  ;;  %741 = vmatprep.mubr.bf16.mxu0 %v2094_v0  ;;  %v1760_v43 = vrot.slane %v2262_v21, 9  ;;  %v916_v21 = vor.u32 %v915_v57, %v914_v54  ;;  %v932_v9 = vor.u32 %v931_v7, %v930_v24 }
  0x52   :  { %524 = vmatprep.mubr.bf16.mxu1 %v2094_v0 }
  0x53   :  { %v640_v52 = vsel %vm2331_vm9, %v1760_v43, %v639_v44  ;;  %v917_v18 = vrot.slane %v916_v21, 4 }
  0x55   :  { %v923_v34 = vsel %vm2299_vm6, %v917_v18, %v922_v19 }
  0x58   :  { %1774 = vmatmul.mubr.msk.bf16.vlgmr.msra.gmra.mxu0 %vm257_vm3, %v1764_v51 }
  0x59   :  { %1750 = vmatmul.mubr.msk.bf16.gmra.mxu1 %vm257_vm3, %v1740_v15  ;;  %751 = vmatprep.mubr.bf16.mxu0 %v2094_v0  ;;  %v643_v15 = vrot.slane %v2283_v49, 5  ;;  %v933_v49 = vsel %vm2299_vm6, %v927_v4, %v932_v9 }
  0x5a   :  { %534 = vmatprep.mubr.bf16.mxu1 %v2094_v0  ;;  %1917 = vmatpush3.bf16.msra.mxu0 %v1993_v56  ;;  %v1784_v63 = vcombine.low %v923_v34, %v933_v49  ;;  %v2005_v56 = vld [vmem:[#allocation5 + $0x70] sm:$0xff]  }
  0x5b   :  { %1918 = vmatprep.subr.bf16.mxu0 %v1997_v13  ;;  %v644_v55 = vsel %vm2331_vm9, %v1761_v50, %v643_v15  ;;  %v2021_v50 = vld [vmem:[#allocation5] sm:$0xff]  }
  0x5c   :  { %v1766_v58 = vcombine.low %v640_v52, %v644_v55 }
  0x5e   :  { %1919 = vmatpush3.bf16.msra.mxu0 %v1997_v13  ;;  %v2018_v13 = vld [vmem:[#allocation5 + $0x48] sm:$0xff]  }
  0x5f   :  { %1928 = vmatprep.subr.bf16.mxu0 %v2095_v23 }
  0x60   :  { %1775 = vmatmul.mubr.msk.bf16.gmra.mxu0 %vm257_vm3, %v1765_v42 }
  0x61   :  { %1751 = vmatmul.mubr.msk.bf16.gmra.mxu1 %vm257_vm3, %v1741_v30  ;;  %761 = vmatprep.mubr.bf16.mxu0 %v2094_v0 }
  0x62   :  { %1908 = vmatprep.mubr.msk.bf16.mxu1 %vm257_vm3, %v1764_v51 }
  0x68   :  { %1776 = vmatmul.mubr.msk.bf16.gmra.mxu0 %vm257_vm3, %v1766_v58 }
  0x69   :  { %1909 = vmatmul.mubr.msk.bf16.vlgmr.msra.gmra.mxu1 %vm257_vm3, %v1765_v42  ;;  %771 = vmatprep.mubr.bf16.mxu0 %v2094_v0 }
  0x6a   :  { %1023 = vmatpush1.bf16.msra.mxu1 %v1990_v16  ;;  %1912 = vmatprep.mubr.msk.bf16.mxu1 %vm257_vm3, %v1766_v58 }
  0x6b   :  { %1024 = vmatprep.subr.bf16.mxu1 %v1996_v32 }
  0x6e   :  { %1025 = vmatpush1.bf16.msra.mxu1 %v1994_v59 }
  0x6f   :  { %1849 = vmatprep.subr.bf16.mxu1 %v2002_v26 }
  0x70   :  { %1777 = vmatmul.mubr.msk.bf16.gmra.mxu0 %vm257_vm3, %v2358_v12 }
  0x71   :  { %1913 = vmatmul.mubr.msk.bf16.gmra.mxu1 %vm257_vm3, %v2358_v12  ;;  %1920 = vmatprep.mubr.msk.bf16.mxu0 %vm257_vm3, %v2375_v2  ;;  %v1999_v12 = vld [vmem:[#allocation5 + $0xb0] sm:$0xff]  }
  0x72   :  { %1042 = vmatprep.mubr.bf16.mxu1 %v2094_v0 }
  0x78   :  { %1921 = vmatmul.mubr.msk.bf16.vlgmr.msra.gmra.mxu0 %vm257_vm3, %v2318_v45 }
  0x79   :  { %1792 = vmatmul.mubr.msk.bf16.vlgmr.msra.gmra.mxu1 %vm257_vm3, %v2375_v2  ;;  %1924 = vmatprep.mubr.msk.bf16.mxu0 %vm257_vm3, %v1784_v63  ;;  %v2000_v2 = vld [vmem:[#allocation5 + $0xa8] sm:$0xff]  }
  0x7a   :  { %1052 = vmatprep.mubr.bf16.mxu1 %v2094_v0  ;;  %1929 = vmatpush3.bf16.msra.mxu0 %v1998_v28 }
  0x7b   :  { %1930 = vmatprep.subr.bf16.mxu0 %v2095_v23  ;;  %1850 = vmatpush3.bf16.msra.mxu1 %v2003_v27 }
  0x7c   :  { %1851 = vmatprep.subr.bf16.mxu1 %v2005_v56 }
  0x7e   :  { %1931 = vmatpush3.bf16.msra.mxu0 %v1999_v12 }
  0x7f   :  { %1932 = vmatprep.subr.bf16.mxu0 %v2095_v23  ;;  %1852 = vmatpush3.bf16.msra.mxu1 %v2006_v33 }
  0x80   :  { %1925 = vmatmul.mubr.msk.bf16.gmra.mxu0 %vm257_vm3, %v2412_v48  ;;  %1853 = vmatprep.subr.bf16.mxu1 %v2008_v6 }
  0x81   :  { %1793 = vmatmul.mubr.msk.bf16.gmra.mxu1 %vm257_vm3, %v2318_v45  ;;  %v2001_v45 = vld [vmem:[#allocation5 + $0xa0] sm:$0xff]   ;;  %1944 = vmatprep.mubr.msk.bf16.mxu0 %vm2096_vm10, %v2095_v23 }
  0x82   :  { %1062 = vmatprep.mubr.bf16.mxu1 %v2094_v0  ;;  %1933 = vmatpush3.bf16.msra.mxu0 %v2000_v2 }
  0x83   :  { %1934 = vmatprep.subr.bf16.mxu0 %v2095_v23  ;;  %1854 = vmatpush3.bf16.msra.mxu1 %v2009_v10 }
  0x84   :  { %1855 = vmatprep.subr.bf16.mxu1 %v2011_v29 }
  0x86   :  { %1935 = vmatpush3.bf16.msra.mxu0 %v2001_v45 }
  0x87   :  { %1936 = vmatprep.subr.bf16.mxu0 %v2095_v23  ;;  %1856 = vmatpush3.bf16.msra.mxu1 %v2012_v8 }
  0x88   :  { %1857 = vmatprep.subr.bf16.mxu1 %v2014_v38 }
  0x89   :  { %1794 = vmatmul.mubr.msk.bf16.gmra.mxu1 %vm257_vm3, %v1784_v63 }
  0x8a   :  { %1072 = vmatprep.mubr.bf16.mxu1 %v2094_v0  ;;  %v2004_v0 = vld [vmem:[#allocation5 + $0x98] sm:$0xff]  }
  0x8b   :  { %1937 = vmatpush3.bf16.msra.mxu0 %v2004_v0  ;;  %1858 = vmatpush3.bf16.msra.mxu1 %v2015_v46 }
  0x8c   :  { %1938 = vmatprep.subr.bf16.mxu0 %v2095_v23  ;;  %1859 = vmatprep.subr.bf16.mxu1 %v2016_v14 }
  0x8f   :  { %1939 = vmatpush3.bf16.msra.mxu0 %v2007_v37  ;;  %1860 = vmatpush3.bf16.msra.mxu1 %v2017_v22 }
  0x90   :  { %1940 = vmatprep.subr.bf16.mxu0 %v2095_v23  ;;  %1861 = vmatprep.subr.bf16.mxu1 %v2018_v13 }
  0x91   :  { %1795 = vmatmul.mubr.msk.bf16.gmra.mxu1 %vm257_vm3, %v2412_v48  ;;  %vm1361_vm3 = vcmask 1046534  }
  0x93   :  { %1941 = vmatpush3.bf16.msra.mxu0 %v2010_v17  ;;  %1862 = vmatpush3.bf16.msra.mxu1 %v2019_v3 }
  0x94   :  { %1942 = vmatprep.subr.bf16.mxu0 %v2095_v23  ;;  %1863 = vmatprep.subr.bf16.mxu1 %v2020_v40 }
  0x97   :  { %1943 = vmatpush3.bf16.msra.mxu0 %v2013_v53  ;;  %1864 = vmatpush3.bf16.msra.mxu1 %v2021_v50  ;;  %v1400_v53 = vlaneseq }
  0x99   :  { %v2524_v14 = vshrl.u32 %v1400_v53, 7 }
  0x9b   :  { %2691 = vst [vmem:[#allocation20_spill] sm:$0xff] %v2524_v14  ;;  %v1410_v50 = vsub.s32 2, %v2524_v14 }
  0xed   :  { %v304_v30 = vpop.f32.mrf.mxu0 }
  0xef   :  { %v306_v11 = vpop.f32.mrf.mxu0 }
  0xf0   :  { %v2478_v31 = vpop.f32.mrf.mxu1 }
  0xf1   :  { %2682 = vst [vmem:[#allocation11_spill] sm:$0xff] %v2478_v31  ;;  %v308_v35 = vpop.f32.mrf.mxu0 }
  0xf2   :  { %v2480_v39 = vpop.f32.mrf.mxu1 }
  0xf3   :  { %2683 = vst [vmem:[#allocation12_spill] sm:$0xff] %v2480_v39  ;;  %v2482_v25 = vpop.f32.mrf.mxu0 }
  0xf4   :  { %v2484_v36 = vpop.f32.mrf.mxu1 }
  0xf5   :  { %2684 = vst [vmem:[#allocation13_spill] sm:$0xff] %v2484_v36 }
  0xf6   :  { %v2486_v47 = vpop.f32.mrf.mxu1 }
  0xf7   :  { %2685 = vst [vmem:[#allocation14_spill] sm:$0xff] %v2486_v47  ;;  %v2488_v48 = vpop.f32.mrf.mxu0 }
  0xf8   :  { %v2490_v51 = vpop.f32.mrf.mxu1 }
  0xf9   :  { %v2492_v42 = vpop.f32.mrf.mxu0 }
  0xfa   :  { %v2494_v43 = vpop.f32.mrf.mxu1 }
  0xfb   :  { %v2496_v44 = vpop.f32.mrf.mxu0 }
  0xfc   :  { %v1887_v15 = vpop.f32.mrf.mxu1 }
  0xfd   :  { %v2498_v52 = vpop.f32.mrf.mxu0 }
  0xfe   :  { %v2500_v55 = vpop.f32.mrf.mxu1 }
 0x100   :  { %v2502_v58 = vpop.f32.mrf.mxu0 }
 0x101   :  { %v2504_v54 = vpop.f32.mrf.mxu1 }
 0x102   :  { %v2506_v57 = vpop.f32.mrf.mxu0 }
 0x103   :  { %2686 = vst [vmem:[#allocation15_spill] sm:$0xff] %v2506_v57  ;;  %v2508_v16 = vpop.f32.mrf.mxu1 }
 0x104   :  { %v2510_v60 = vpop.f32.mrf.mxu0 }
 0x105   :  { %2687 = vst [vmem:[#allocation16_spill] sm:$0xff] %v2510_v60  ;;  %v2512_v61 = vpop.f32.mrf.mxu1 }
 0x106   :  { %v2514_v62 = vpop.f32.mrf.mxu0 }
 0x107   :  { %2688 = vst [vmem:[#allocation17_spill] sm:$0xff] %v2514_v62  ;;  %v2516_v1 = vpop.f32.mrf.mxu1 }
 0x108   :  { %v1898_v32 = vpop.f32.mrf.mxu0 }
 0x109   :  { %v506_v21 = vpop.f32.mrf.mxu1  ;;  %v588_v36 = vadd.f32 %v1898_v32, %v2490_v51 }
 0x10a   :  { %v2518_v5 = vadd.f32 %v506_v21, %v304_v30  ;;  %v579_v59 = vpop.f32.mrf.mxu0 }
 0x10b   :  { %v508_v20 = vpop.f32.mrf.mxu1  ;;  %v580_v39 = vadd.f32 %v579_v59, %v2494_v43 }
 0x10c   :  { %v2520_v41 = vadd.f32 %v508_v20, %v306_v11  ;;  %v1899_v24 = vpop.f32.mrf.mxu0  ;;  %v2530_v20 = vld [vmem:[%s2670_s2] sm:$0x7] }
 0x10d   :  { %v510_v7 = vpop.f32.mrf.mxu1  ;;  %v591_v53 = vadd.f32 %v1899_v24, %v1887_v15  ;;  %v2535_v62 = vrot.slane %v2530_v20, %v1410_v50  ;;  %v2700_v50 = vld [vmem:[#allocation14_spill] sm:$0xff] }
 0x10e   :  { %2689 = vst [vmem:[#allocation18_spill] sm:$0xff] %v2520_v41  ;;  %v2522_v18 = vadd.f32 %v510_v7, %v308_v35  ;;  %v582_v19 = vpop.f32.mrf.mxu0 }
 0x10f   :  { %v512_v4 = vpop.f32.mrf.mxu1 }
 0x110   :  { %2690 = vst [vmem:[#allocation19_spill] sm:$0xff] %v2522_v18  ;;  %v1902_v9 = vpop.f32.mrf.mxu0  ;;  %v513_v14 = vadd.f32 %v512_v4, %v2482_v25  ;;  %v583_v18 = vadd.f32 %v582_v19, %v2500_v55  ;;  %v2692_v19 = vld [vmem:[#allocation15_spill] sm:$0xff] }
 0x111   :  { %v516_v34 = vpop.f32.mrf.mxu1  ;;  %v604_v41 = vadd.f32 %v1902_v9, %v2504_v54 }
 0x112   :  { %v595_v49 = vpop.f32.mrf.mxu0  ;;  %v517_v60 = vadd.f32 %v516_v34, %v2488_v48 }
 0x113   :  { %v518_v63 = vpop.f32.mrf.mxu1  ;;  %v596_v43 = vadd.f32 %v595_v49, %v2508_v16  ;;  %v2694_v16 = vld [vmem:[#allocation16_spill] sm:$0xff] }
 0x114   :  { %v1903_v23 = vpop.f32.mrf.mxu0  ;;  %v519_v51 = vadd.f32 %v518_v63, %v2492_v42  ;;  %v2696_v63 = vld [vmem:[#allocation17_spill] sm:$0xff] }
 0x115   :  { %v520_v28 = vpop.f32.mrf.mxu1  ;;  %v607_v32 = vadd.f32 %v1903_v23, %v2512_v61  ;;  %v2693_v42 = vld [vmem:[#allocation18_spill] sm:$0xff] }
 0x116   :  { %v598_v12 = vpop.f32.mrf.mxu0  ;;  %v521_v15 = vadd.f32 %v520_v28, %v2496_v44  ;;  %v2697_v28 = vld [vmem:[#allocation11_spill] sm:$0xff] }
 0x117   :  { %v522_v2 = vpop.f32.mrf.mxu1  ;;  %v599_v25 = vadd.f32 %v598_v12, %v2516_v1  ;;  %v2695_v44 = vld [vmem:[#allocation19_spill] sm:$0xff] }
 0x118   :  { %v743_v45 = vpop.f32.mrf.mxu0  ;;  %v523_v24 = vadd.f32 %v522_v2, %v2498_v52 }
 0x119   :  { %v526_v26 = vpop.f32.mrf.mxu1  ;;  %v847_v48 = vadd.f32 %v743_v45, %v2518_v5  ;;  %v2698_v5 = vld [vmem:[#allocation12_spill] sm:$0xff] }
 0x11a   :  { %v745_v27 = vpop.f32.mrf.mxu0  ;;  %v527_v55 = vadd.f32 %v526_v26, %v2502_v58  ;;  %v2699_v26 = vld [vmem:[#allocation13_spill] sm:$0xff] }
 0x11b   :  { %v528_v0 = vpop.f32.mrf.mxu1  ;;  %v848_v9 = vadd.f32 %v745_v27, %v2693_v42 }
 0x11c   :  { %v747_v56 = vpop.f32.mrf.mxu0  ;;  %v529_v4 = vadd.f32 %v528_v0, %v2692_v19 }
 0x11d   :  { %v530_v33 = vpop.f32.mrf.mxu1  ;;  %v850_v49 = vadd.f32 %v747_v56, %v2695_v44 }
 0x11e   :  { %v749_v37 = vpop.f32.mrf.mxu0  ;;  %v531_v34 = vadd.f32 %v530_v33, %v2694_v16 }
 0x11f   :  { %v532_v6 = vpop.f32.mrf.mxu1  ;;  %v851_v52 = vadd.f32 %v749_v37, %v513_v14 }
 0x120   :  { %v753_v10 = vpop.f32.mrf.mxu0  ;;  %v533_v23 = vadd.f32 %v532_v6, %v2696_v63 }
 0x121   :  { %v536_v17 = vpop.f32.mrf.mxu1  ;;  %v2555_v12 = vadd.f32 %v753_v10, %v517_v60 }
 0x122   :  { %v755_v29 = vpop.f32.mrf.mxu0  ;;  %v537_v1 = vadd.f32 %v536_v17, %v2697_v28 }
 0x123   :  { %v538_v30 = vpop.f32.mrf.mxu1  ;;  %v2558_v45 = vadd.f32 %v755_v29, %v519_v51 }
 0x124   :  { %v757_v8 = vpop.f32.mrf.mxu0  ;;  %v539_v2 = vadd.f32 %v538_v30, %v2698_v5 }
 0x125   :  { %v540_v11 = vpop.f32.mrf.mxu1  ;;  %v2561_v27 = vadd.f32 %v757_v8, %v521_v15 }
 0x126   :  { %v759_v38 = vpop.f32.mrf.mxu0  ;;  %v541_v0 = vadd.f32 %v540_v11, %v2699_v26 }
 0x127   :  { %v542_v35 = vpop.f32.mrf.mxu1  ;;  %v2564_v19 = vadd.f32 %v759_v38, %v523_v24 }
 0x128   :  { %v763_v46 = vpop.f32.mrf.mxu0  ;;  %v543_v56 = vadd.f32 %v542_v35, %v2700_v50 }
 0x129   :  { %v1910_v22 = vpop.f32.mrf.mxu1  ;;  %v2566_v6 = vadd.f32 %v763_v46, %v527_v55 }
 0x12a   :  { %v765_v13 = vpop.f32.mrf.mxu0  ;;  %v855_v37 = vadd.f32 %v1910_v22, %v588_v36 }
 0x12b   :  { %v816_v3 = vpop.f32.mrf.mxu1  ;;  %v2568_v60 = vadd.f32 %v765_v13, %v529_v4 }
 0x12c   :  { %v767_v40 = vpop.f32.mrf.mxu0  ;;  %v849_v10 = vadd.f32 %v816_v3, %v580_v39 }
 0x12d   :  { %v1911_v21 = vpop.f32.mrf.mxu1  ;;  %v2570_v14 = vadd.f32 %v767_v40, %v531_v34 }
 0x12e   :  { %v769_v7 = vpop.f32.mrf.mxu0  ;;  %v858_v29 = vadd.f32 %v1911_v21, %v591_v53 }
 0x12f   :  { %v819_v47 = vpop.f32.mrf.mxu1  ;;  %v2572_v51 = vadd.f32 %v769_v7, %v533_v23 }
 0x130   :  { %v773_v31 = vpop.f32.mrf.mxu0  ;;  %v852_v8 = vadd.f32 %v819_v47, %v583_v18 }
 0x131   :  { %v1914_v57 = vpop.f32.mrf.mxu1  ;;  %v2574_v11 = vadd.f32 %v773_v31, %v537_v1 }
 0x132   :  { %v775_v59 = vpop.f32.mrf.mxu0  ;;  %v2576_v38 = vadd.f32 %v1914_v57, %v604_v41 }
 0x133   :  { %v832_v54 = vpop.f32.mrf.mxu1  ;;  %v2578_v46 = vadd.f32 %v775_v59, %v539_v2 }
 0x134   :  { %v777_v61 = vpop.f32.mrf.mxu0  ;;  %v2580_v36 = vadd.f32 %v832_v54, %v596_v43 }
 0x135   :  { %v1915_v58 = vpop.f32.mrf.mxu1  ;;  %v2582_v39 = vadd.f32 %v777_v61, %v541_v0 }
 0x136   :  { %v779_v33 = vpop.f32.mrf.mxu0  ;;  %v2584_v3 = vadd.f32 %v1915_v58, %v607_v32 }
 0x137   :  { %v835_v17 = vpop.f32.mrf.mxu1  ;;  %v2587_v31 = vadd.f32 %v779_v33, %v543_v56 }
 0x138   :  { %v1922_v30 = vpop.f32.mrf.mxu0  ;;  %v2590_v53 = vadd.f32 %v835_v17, %v599_v25 }
 0x139   :  { %v1044_v15 = vpop.f32.mrf.mxu1  ;;  %v1156_v35 = vadd.f32 %v1922_v30, %v855_v37 }
 0x13a   :  { %v1148_v22 = vadd.f32 %v1044_v15, %v847_v48  ;;  %v1117_v13 = vpop.f32.mrf.mxu0 }
 0x13b   :  { %v1301_v40 = vsel %vm1286_vm11, %v1156_v35, -inf  ;;  %v1046_v21 = vpop.f32.mrf.mxu1  ;;  %v1150_v47 = vadd.f32 %v1117_v13, %v849_v10 }
 0x13c   :  { %v1173_v18 = vsel %vm1172_vm12, %v1148_v22, -inf  ;;  %v1302_v57 = vrot.slane %v1301_v40, 4  ;;  %v1149_v41 = vadd.f32 %v1046_v21, %v848_v9  ;;  %v1923_v7 = vpop.f32.mrf.mxu0 }
 0x13d   :  { %v1174_v43 = vrot.slane %v1173_v18, 4  ;;  %v1287_v59 = vsel %vm1286_vm11, %v1150_v47, -inf  ;;  %v1048_v24 = vpop.f32.mrf.mxu1  ;;  %v1159_v55 = vadd.f32 %v1923_v7, %v858_v29 }
 0x13e   :  { %v1303_v32 = vmax.f32 %v1301_v40, %v1302_v57  ;;  %v1230_v48 = vsel %vm1229_vm13, %v1149_v41, -inf  ;;  %v1288_v54 = vrot.slane %v1287_v59, 4  ;;  %v1151_v4 = vadd.f32 %v1048_v24, %v850_v49  ;;  %v1120_v42 = vpop.f32.mrf.mxu0 }
 0x13f   :  { %v1175_v16 = vmax.f32 %v1173_v18, %v1174_v43  ;;  %v1231_v34 = vrot.slane %v1230_v48, 4  ;;  %v1308_v44 = vsel %vm1286_vm11, %v1159_v55, -inf  ;;  %v1050_v61 = vpop.f32.mrf.mxu1  ;;  %v1153_v9 = vadd.f32 %v1120_v42, %v852_v8 }
 0x140   :  { %v1304_v63 = vrot.slane %v1303_v32, 2  ;;  %v1289_v25 = vmax.f32 %v1287_v59, %v1288_v54  ;;  %v1180_v23 = vsel %vm1172_vm12, %v1151_v4, -inf  ;;  %v1309_v28 = vrot.slane %v1308_v44, 4  ;;  %v1926_v21 = vpop.f32.mrf.mxu0 }
 0x141   :  { %v1176_v1 = vrot.slane %v1175_v16, 2  ;;  %v1232_v58 = vmax.f32 %v1230_v48, %v1231_v34  ;;  %v1181_v5 = vrot.slane %v1180_v23, 4  ;;  %v1152_v2 = vadd.f32 %v1050_v61, %v851_v52  ;;  %v1054_v26 = vpop.f32.mrf.mxu1 }
 0x142   :  { %v1305_v0 = vmax.f32 %v1303_v32, %v1304_v63  ;;  %v1290_v33 = vrot.slane %v1289_v25, 2  ;;  %v1310_v49 = vmax.f32 %v1308_v44, %v1309_v28  ;;  %v1294_v50 = vsel %vm1286_vm11, %v1153_v9, -inf  ;;  %v1133_v9 = vpop.f32.mrf.mxu0 }
 0x143   :  { %v1177_v56 = vmax.f32 %v1175_v16, %v1176_v1  ;;  %v1233_v37 = vrot.slane %v1232_v58, 2  ;;  %v1182_v17 = vmax.f32 %v1180_v23, %v1181_v5  ;;  %v1237_v10 = vsel %vm1229_vm13, %v1152_v2, -inf  ;;  %v1056_v29 = vpop.f32.mrf.mxu1 }
 0x144   :  { %v1306_v30 = vrot.slane %v1305_v0, 1  ;;  %v1291_v8 = vmax.f32 %v1289_v25, %v1290_v33  ;;  %v1311_v15 = vrot.slane %v1310_v49, 2  ;;  %v1238_v35 = vrot.slane %v1237_v10, 4 }
 0x145   :  { %v1178_v22 = vrot.slane %v1177_v56, 1  ;;  %v1234_v13 = vmax.f32 %v1232_v58, %v1233_v37  ;;  %v1183_v52 = vrot.slane %v1182_v17, 2  ;;  %v1295_v40 = vrot.slane %v1294_v50, 4  ;;  %v1058_v47 = vpop.f32.mrf.mxu1 }
 0x146   :  { %v1307_v18 = vmax.f32 %v1305_v0, %v1306_v30  ;;  %v1292_v57 = vrot.slane %v1291_v8, 1  ;;  %v1312_v41 = vmax.f32 %v1310_v49, %v1311_v15  ;;  %v1239_v7 = vmax.f32 %v1237_v10, %v1238_v35 }
 0x147   :  { %v1179_v43 = vmax.f32 %v1177_v56, %v1178_v22  ;;  %v1235_v59 = vrot.slane %v1234_v13, 1  ;;  %v1184_v24 = vmax.f32 %v1182_v17, %v1183_v52  ;;  %v1296_v55 = vmax.f32 %v1294_v50, %v1295_v40  ;;  %v1060_v32 = vpop.f32.mrf.mxu1  ;;  %v1927_v17 = vpop.f32.mrf.mxu0 }
 0x148   :  { %v1293_v48 = vmax.f32 %v1291_v8, %v1292_v57  ;;  %v1313_v54 = vrot.slane %v1312_v41, 1  ;;  %v1240_v4 = vrot.slane %v1239_v7, 2  ;;  %v1154_v42 = vadd.f32 %v1054_v26, %v2555_v12 }
 0x149   :  { %v1236_v16 = vmax.f32 %v1234_v13, %v1235_v59  ;;  %v1185_v34 = vrot.slane %v1184_v24, 1  ;;  %v1297_v44 = vrot.slane %v1296_v55, 2  ;;  %v1168_v61 = vadd.f32 %v1926_v21, %v2576_v38  ;;  %v2600_v63 = vpop.f32.mrf.mxu1 }
 0x14a   :  { %v1314_v25 = vmax.f32 %v1312_v41, %v1313_v54  ;;  %v1241_v23 = vmax.f32 %v1239_v7, %v1240_v4  ;;  %v1187_v28 = vsel %vm1172_vm12, %v1154_v42, -inf  ;;  %v1155_v1 = vadd.f32 %v1056_v29, %v2558_v45  ;;  %v1136_v54 = vpop.f32.mrf.mxu0 }
 0x14b   :  { %v1186_v58 = vmax.f32 %v1184_v24, %v1185_v34  ;;  %v1298_v5 = vmax.f32 %v1296_v55, %v1297_v44  ;;  %v1188_v2 = vrot.slane %v1187_v28, 4  ;;  %v1329_v12 = vsel %vm1286_vm11, %v1168_v61, -inf  ;;  %v1066_v10 = vpop.f32.mrf.mxu1 }
 0x14c   :  { %v1242_v26 = vrot.slane %v1241_v23, 1  ;;  %v1330_v0 = vrot.slane %v1329_v12, 4  ;;  %v1244_v33 = vsel %vm1229_vm13, %v1155_v1, -inf  ;;  %v1162_v38 = vadd.f32 %v1133_v9, %v2580_v36 }
 0x14d   :  { %v1352_v49 = vsel %vm1351_vm14, %v1186_v58, %v1179_v43  ;;  %v1299_v50 = vrot.slane %v1298_v5, 1  ;;  %v1189_v56 = vmax.f32 %v1187_v28, %v1188_v2  ;;  %v1245_v37 = vrot.slane %v1244_v33, 4  ;;  %v1068_v59 = vpop.f32.mrf.mxu1 }
 0x14e   :  { %v1243_v30 = vmax.f32 %v1241_v23, %v1242_v26  ;;  %v1331_v45 = vmax.f32 %v1329_v12, %v1330_v0  ;;  %v1315_v29 = vsel %vm1286_vm11, %v1162_v38, -inf  ;;  %v1157_v8 = vadd.f32 %v1058_v47, %v2561_v27 }
 0x14f   :  { %v1300_v15 = vmax.f32 %v1298_v5, %v1299_v50  ;;  %v1190_v35 = vrot.slane %v1189_v56, 2  ;;  %v1246_v22 = vmax.f32 %v1244_v33, %v1245_v37  ;;  %v1316_v13 = vrot.slane %v1315_v29, 4  ;;  %v1070_v1 = vpop.f32.mrf.mxu1 }
 0x150   :  { %v1374_v52 = vsel %vm1351_vm14, %v1243_v30, %v1236_v16  ;;  %v1332_v36 = vrot.slane %v1331_v45, 2  ;;  %v1194_v40 = vsel %vm1172_vm12, %v1157_v8, -inf  ;;  %v1171_v21 = vadd.f32 %v1927_v17, %v2584_v3 }
 0x151   :  { %v1390_v57 = vsel %vm1351_vm14, %v1300_v15, %v1293_v48  ;;  %v1191_v41 = vmax.f32 %v1189_v56, %v1190_v35  ;;  %v1247_v7 = vrot.slane %v1246_v22, 2  ;;  %v1317_v43 = vmax.f32 %v1315_v29, %v1316_v13  ;;  %v1074_v30 = vpop.f32.mrf.mxu1 }
 0x152   :  { %v1391_v27 = vsel %vm1353_vm15, %v1307_v18, %v1390_v57  ;;  %v1333_v47 = vmax.f32 %v1331_v45, %v1332_v36  ;;  %v1195_v24 = vrot.slane %v1194_v40, 4  ;;  %v1336_v55 = vsel %vm1286_vm11, %v1171_v21, -inf }
 0x153   :  { %v1192_v4 = vrot.slane %v1191_v41, 1  ;;  %v1248_v42 = vmax.f32 %v1246_v22, %v1247_v7  ;;  %v1318_v16 = vrot.slane %v1317_v43, 2  ;;  %v1392_v34 = vsel %vm1355_vm0, %v1314_v25, %v1391_v27  ;;  %v1076_v7 = vpop.f32.mrf.mxu1 }
 0x154   :  { %v1334_v44 = vrot.slane %v1333_v47, 1  ;;  %v1196_v3 = vmax.f32 %v1194_v40, %v1195_v24  ;;  %v1337_v61 = vrot.slane %v1336_v55, 4  ;;  %v1158_v48 = vadd.f32 %v1060_v32, %v2564_v19 }
 0x155   :  { %v1193_v9 = vmax.f32 %v1191_v41, %v1192_v4  ;;  %v1249_v23 = vrot.slane %v1248_v42, 1  ;;  %v1319_v28 = vmax.f32 %v1317_v43, %v1318_v16  ;;  %v1165_v18 = vadd.f32 %v1136_v54, %v2590_v53 }
 0x156   :  { %v2619_v58 = vmax.f32 %v1333_v47, %v1334_v44  ;;  %v1197_v5 = vrot.slane %v1196_v3, 2  ;;  %v1338_v2 = vmax.f32 %v1336_v55, %v1337_v61  ;;  %v1251_v12 = vsel %vm1229_vm13, %v1158_v48, -inf }
 0x157   :  { %v1354_v26 = vsel %vm1353_vm15, %v1193_v9, %v1352_v49  ;;  %v1250_v25 = vmax.f32 %v1248_v42, %v1249_v23  ;;  %v1320_v0 = vrot.slane %v1319_v28, 1  ;;  %v1252_v33 = vrot.slane %v1251_v12, 4  ;;  %v1078_v23 = vpop.f32.mrf.mxu1 }
 0x158   :  { %v1198_v38 = vmax.f32 %v1196_v3, %v1197_v5  ;;  %v1339_v50 = vrot.slane %v1338_v2, 2  ;;  %v1322_v19 = vsel %vm1286_vm11, %v1165_v18, -inf  ;;  %v1160_v32 = vadd.f32 %v2600_v63, %v2566_v6 }
 0x159   :  { %v1375_v53 = vsel %vm1353_vm15, %v1250_v25, %v1374_v52  ;;  %v1321_v56 = vmax.f32 %v1319_v28, %v1320_v0  ;;  %v1253_v37 = vmax.f32 %v1251_v12, %v1252_v33  ;;  %v1323_v17 = vrot.slane %v1322_v19, 4 }
 0x15a   :  { %v1199_v45 = vrot.slane %v1198_v38, 1  ;;  %v1340_v29 = vmax.f32 %v1338_v2, %v1339_v50  ;;  %v1201_v49 = vsel %vm1172_vm12, %v1160_v32, -inf  ;;  %v1161_v8 = vadd.f32 %v1066_v10, %v2568_v60 }
 0x15b   :  { %v1393_v15 = vsel %vm1357_vm1, %v1321_v56, %v1392_v34  ;;  %v1254_v35 = vrot.slane %v1253_v37, 2  ;;  %v1324_v22 = vmax.f32 %v1322_v19, %v1323_v17  ;;  %v1202_v13 = vrot.slane %v1201_v49, 4 }
 0x15c   :  { %v1200_v6 = vmax.f32 %v1198_v38, %v1199_v45  ;;  %v1341_v63 = vrot.slane %v1340_v29, 1  ;;  %v1258_v52 = vsel %vm1229_vm13, %v1161_v8, -inf  ;;  %v1163_v36 = vadd.f32 %v1068_v59, %v2570_v14 }
 0x15d   :  { %v1255_v40 = vmax.f32 %v1253_v37, %v1254_v35  ;;  %v1325_v21 = vrot.slane %v1324_v22, 2  ;;  %v1203_v57 = vmax.f32 %v1201_v49, %v1202_v13  ;;  %v1259_v41 = vrot.slane %v1258_v52, 4 }
 0x15e   :  { %v1356_v43 = vsel %vm1355_vm0, %v1200_v6, %v1354_v26  ;;  %v1342_v60 = vmax.f32 %v1340_v29, %v1341_v63  ;;  %v1208_v10 = vsel %vm1172_vm12, %v1163_v36, -inf  ;;  %v1164_v27 = vadd.f32 %v1070_v1, %v2572_v51 }
 0x15f   :  { %v1256_v47 = vrot.slane %v1255_v40, 1  ;;  %v1326_v24 = vmax.f32 %v1324_v22, %v1325_v21  ;;  %v1204_v55 = vrot.slane %v1203_v57, 2  ;;  %v1260_v54 = vmax.f32 %v1258_v52, %v1259_v41 }
 0x160   :  { %v1209_v4 = vrot.slane %v1208_v10, 4  ;;  %v1265_v14 = vsel %vm1229_vm13, %v1164_v27, -inf  ;;  %v1166_v59 = vadd.f32 %v1074_v30, %v2574_v11  ;;  %v1167_v42 = vadd.f32 %v1076_v7, %v2578_v46 }
 0x161   :  { %v1257_v16 = vmax.f32 %v1255_v40, %v1256_v47  ;;  %v1327_v34 = vrot.slane %v1326_v24, 1  ;;  %v1205_v44 = vmax.f32 %v1203_v57, %v1204_v55  ;;  %v1261_v3 = vrot.slane %v1260_v54, 2 }
 0x162   :  { %v1210_v61 = vmax.f32 %v1208_v10, %v1209_v4  ;;  %v1266_v48 = vrot.slane %v1265_v14, 4  ;;  %v1215_v51 = vsel %vm1172_vm12, %v1166_v59, -inf  ;;  %v1272_v9 = vsel %vm1229_vm13, %v1167_v42, -inf  ;;  %v2701_v4 = vld [vmem:[#allocation20_spill] sm:$0xff] }
 0x163   :  { %v1376_v28 = vsel %vm1355_vm0, %v1257_v16, %v1375_v53  ;;  %v1328_v18 = vmax.f32 %v1326_v24, %v1327_v34  ;;  %v1206_v1 = vrot.slane %v1205_v44, 1  ;;  %v1262_v5 = vmax.f32 %v1260_v54, %v1261_v3  ;;  %v1080_v53 = vpop.f32.mrf.mxu1 }
 0x164   :  { %v1211_v2 = vrot.slane %v1210_v61, 2  ;;  %v1267_v11 = vmax.f32 %v1265_v14, %v1266_v48  ;;  %v1216_v12 = vrot.slane %v1215_v51, 4  ;;  %v1273_v46 = vrot.slane %v1272_v9, 4 }
 0x165   :  { %v1394_v26 = vsel %vm1359_vm2, %v1328_v18, %v1393_v15  ;;  %v1207_v25 = vmax.f32 %v1205_v44, %v1206_v1  ;;  %v1263_v0 = vrot.slane %v1262_v5, 1  ;;  %v1169_v33 = vadd.f32 %v1078_v23, %v2582_v39 }
 0x166   :  { %v1395_v38 = vsel %vm1361_vm3, %v2619_v58, %v1394_v26  ;;  %v1212_v50 = vmax.f32 %v1210_v61, %v1211_v2  ;;  %v1268_v19 = vrot.slane %v1267_v11, 2  ;;  %v1217_v32 = vmax.f32 %v1215_v51, %v1216_v12 }
 0x167   :  { %v1358_v56 = vsel %vm1357_vm1, %v1207_v25, %v1356_v43  ;;  %v1264_v37 = vmax.f32 %v1262_v5, %v1263_v0  ;;  %v1274_v17 = vmax.f32 %v1272_v9, %v1273_v46  ;;  %v1222_v30 = vsel %vm1172_vm12, %v1169_v33, -inf }
 0x168   :  { %v1213_v45 = vrot.slane %v1212_v50, 1  ;;  %v1269_v29 = vmax.f32 %v1267_v11, %v1268_v19  ;;  %v1218_v49 = vrot.slane %v1217_v32, 2  ;;  %v1223_v8 = vrot.slane %v1222_v30, 4 }
 0x169   :  { %v1377_v15 = vsel %vm1357_vm1, %v1264_v37, %v1376_v28  ;;  %v1275_v39 = vrot.slane %v1274_v17, 2  ;;  %v1170_v35 = vadd.f32 %v1080_v53, %v2587_v31  ;;  %v1396_v58 = vsel %vm1363_vm4, %v1342_v60, %v1395_v38 }
 0x16a   :  { %v1214_v22 = vmax.f32 %v1212_v50, %v1213_v45  ;;  %v1270_v13 = vrot.slane %v1269_v29, 1  ;;  %v1219_v6 = vmax.f32 %v1217_v32, %v1218_v49  ;;  %v1224_v63 = vmax.f32 %v1222_v30, %v1223_v8 }
 0x16b   :  { %v1276_v52 = vmax.f32 %v1274_v17, %v1275_v39  ;;  %v1279_v36 = vsel %vm1229_vm13, %v1170_v35, -inf  ;;  %v1417_v40 = vadd.f32 %v2535_v62, %v1396_v58  ;;  %v1402_v14 = vsub.s32 0, %v2701_v4 }
 0x16c   :  { %v1360_v21 = vsel %vm1359_vm2, %v1214_v22, %v1358_v56  ;;  %v1271_v57 = vmax.f32 %v1269_v29, %v1270_v13  ;;  %v1220_v41 = vrot.slane %v1219_v6, 1  ;;  %v1225_v7 = vrot.slane %v1224_v63, 2 }
 0x16d   :  { %v1277_v43 = vrot.slane %v1276_v52, 1  ;;  %v1280_v10 = vrot.slane %v1279_v36, 4  ;;  %v1420_v27 = vmax.f32 %v1417_v40, 0.0  ;;  %v1406_v44 = vsub.s32 1, %v2701_v4 }
 0x16e   :  { %v1221_v31 = vmax.f32 %v1219_v6, %v1220_v41  ;;  %v1226_v47 = vmax.f32 %v1224_v63, %v1225_v7  ;;  %v1378_v60 = vsel %vm1359_vm2, %v1271_v57, %v1377_v15  ;;  %v1403_v61 = vrot.slane %v2530_v20, %v1402_v14 }
 0x16f   :  { %v1278_v24 = vmax.f32 %v1276_v52, %v1277_v43  ;;  %v1281_v55 = vmax.f32 %v1279_v36, %v1280_v10  ;;  %v1423_v54 = vpack.c.bf16 %v1420_v27, %v1420_v27  ;;  %v1407_v9 = vrot.slane %v2530_v20, %v1406_v44  ;;  %v1800_v20 = vld [vmem:[%s2672_s4] ss:$0 sm:$0xff] }
 0x170   :  { %v1362_v59 = vsel %vm1361_vm3, %v1221_v31, %v1360_v21  ;;  %v1227_v62 = vrot.slane %v1226_v47, 1 }
 0x171   :  { %v1282_v42 = vrot.slane %v1281_v55, 2  ;;  %1945 = vmatmul.mubr.bf16.vlgmr.msra.gmra.mxu0 %v1423_v54  ;;  %v1379_v16 = vsel %vm1361_vm3, %v1278_v24, %v1378_v60 }
 0x172   :  { %v1228_v34 = vmax.f32 %v1226_v47, %v1227_v62 }
 0x173   :  { %v1283_v3 = vmax.f32 %v1281_v55, %v1282_v42 }
 0x174   :  { %v1364_v48 = vsel %vm1363_vm4, %v1228_v34, %v1362_v59 }
 0x175   :  { %v1284_v51 = vrot.slane %v1283_v3, 1  ;;  %v1415_v28 = vadd.f32 %v1403_v61, %v1364_v48 }
 0x177   :  { %v1285_v23 = vmax.f32 %v1283_v3, %v1284_v51  ;;  %v1418_v5 = vmax.f32 %v1415_v28, 0.0 }
 0x179   :  { %v1380_v18 = vsel %vm1363_vm4, %v1285_v23, %v1379_v16  ;;  %v1421_v12 = vpack.c.bf16 %v1418_v5, %v1418_v5 }
 0x17a   :  { %v1416_v1 = vadd.f32 %v1407_v9, %v1380_v18 }
 0x17c   :  { %v1419_v2 = vmax.f32 %v1416_v1, 0.0 }
 0x17e   :  { %v1422_v11 = vpack.c.bf16 %v1419_v2, %v1419_v2 }
 0x180   :  { %1655 = vmatprep.mubr.bf16.mxu1 %v1422_v11 }
 0x181   :  { %1656 = vmatmul.mubr.bf16.vlgmr.msra.gmra.mxu1 %v1421_v12 }
 0x231   :  { %v1697_v46 = vpop.f32.mrf.mxu0 }
 0x233   :  { %v1946_v26 = vpop.f32.mrf.mxu0 }
 0x235   :  { %v1700_v25 = vpop.f32.mrf.mxu0 }
 0x237   :  { %v1947_v0 = vpop.f32.mrf.mxu0 }
 0x241   :  { %v1865_v33 = vpop.f32.mrf.mxu1 }
 0x243   :  { %v1866_v38 = vpop.f32.mrf.mxu1 }
 0x244   :  { %v1867_v50 = vadd.f32 %v1866_v38, %v1865_v33 }
 0x245   :  { %v1868_v19 = vpop.f32.mrf.mxu1 }
 0x246   :  { %v1658_v32 = vadd.f32 %v1867_v50, %v1800_v20 }
 0x247   :  { %v1869_v53 = vpop.f32.mrf.mxu1 }
 0x248   :  { %v1698_v56 = vadd.f32 %v1697_v46, %v1658_v32 }
 0x24a   :  { %1703 = vst [vmem:[#allocation7] sm:$0xff] %v1698_v56 }
 0x24b   :  { %2073 = shalt.err (!%p2070_p0)
}
 0x24c   :  { %1713 = dma.vmem_to_hbm [thread:$0]  %s1711_s13, 128, %s2673_s5, [#allocation4]  }
 0x24d   :  { %2086 = dma.done.wait [#allocation4], 128  }
 0x24e   :  { %2087 = vsyncadd [#allocation4], 4294967168 }
 0x24f   :  { %1717 = vsyncpa [#allocation3], 1 }
 0x250   :  { %1718 = vsyncpa [#allocation6], 1 }
 0x251   :  { %1719 = vsyncpa [#allocation4], 1 }

</bundles_post_ra>
